<compile_context>
chip_gen: v7x
topology: tpu7x:2x2x1
jax: 0.10.0
libtpu: 0.0.40
codegen_flags: <defaults>
</compile_context>

<pallas_src>
import math

import jax
import jax.numpy as jnp
from jax import lax
from jax.experimental import pallas as pl
from jax.experimental.pallas import tpu as pltpu

# ---- model hyper-parameters (small, consistent with the module) ----
D_MODEL = 32
N_HEADS = 4
DIM_HEAD = D_MODEL // N_HEADS
DFF = 64
LORA_R = 16
LN_EPS = 1e-5
SCALE = math.sqrt(DIM_HEAD)          # the `scale` buffer: sqrt(dim_head)

_NEG_INF = -1e30                     # additive mask value for cross-batch positions
_INV_SQRT2 = 0.7071067811865476


def _layernorm(v, gamma, beta):
    # PyTorch nn.LayerNorm over the last dim, eps=1e-5, biased variance.
    mu = jnp.mean(v, axis=-1, keepdims=True)
    var = jnp.mean(jnp.square(v - mu), axis=-1, keepdims=True)
    return (v - mu) * lax.rsqrt(var + LN_EPS) * gamma + beta


def _make_kernel(has_mask):
    """Build the single-step transformer-block kernel (mask operand optional)."""

    def kernel(*refs):
        if has_mask:
            (x_ref, mask_ref, wq_ref, wk_ref, wv_ref, gamma_ref, beta_ref,
             w1_ref, b1_ref, w2_ref, b2_ref, o_ref) = refs
        else:
            (x_ref, wq_ref, wk_ref, wv_ref, gamma_ref, beta_ref,
             w1_ref, b1_ref, w2_ref, b2_ref, o_ref) = refs
            mask_ref = None

        x = x_ref[...].astype(jnp.float32)          # (N, D), N = B*L
        gamma = gamma_ref[...]                      # (1, D)
        beta = beta_ref[...]                        # (1, D)

        # ---- x1 = layer_norm1(inputs) ----
        x1 = _layernorm(x, gamma, beta)

        # Hoisted out of the head loop: single VMEM load of the additive mask.
        mask = mask_ref[...] if has_mask else None  # (N, N) or None

        # ---- multi-head self-attention (heads unrolled, batch folded into rows) ----
        ctx_heads = []
        for h in range(N_HEADS):
            # wq has 1/sqrt(dim_head) folded in host-side; no lane slicing in-kernel.
            q = jnp.dot(x1, wq_ref[h], preferred_element_type=jnp.float32)   # (N, dh)
            k = jnp.dot(x1, wk_ref[h], preferred_element_type=jnp.float32)   # (N, dh)
            v = jnp.dot(x1, wv_ref[h], preferred_element_type=jnp.float32)   # (N, dh)

            # scores over all (B*L) rows/cols; block-diagonal mask keeps batches apart.
            s = lax.dot_general(q, k, (((1,), (1,)), ((), ())),
                                preferred_element_type=jnp.float32)          # (N, N)
            if mask is not None:
                s = s + mask

            m = jnp.max(s, axis=-1, keepdims=True)
            e = jnp.exp(s - m)
            # EUP approx reciprocal (off the VALU); applied after the PV matmul so we
            # scale an (N, dh) result instead of (N, N) probabilities.
            inv = pl.reciprocal(jnp.sum(e, axis=-1, keepdims=True), approx=True)
            ctx_heads.append(jnp.dot(e, v, preferred_element_type=jnp.float32) * inv)

        attn = jnp.concatenate(ctx_heads, axis=-1)  # (N, D), head-major columns

        # ---- residual + second application of layer_norm1 (reference quirk) ----
        x2 = attn + x1
        x3 = _layernorm(x2, gamma, beta)
        # dropout: identity in eval mode

        # ---- FFN: Linear -> exact GELU (erf, matches nn.GELU default) -> Linear ----
        hdn = jnp.dot(x3, w1_ref[...], preferred_element_type=jnp.float32) + b1_ref[...]
        hdn = 0.5 * hdn * (1.0 + lax.erf(hdn * _INV_SQRT2))
        y = jnp.dot(hdn, w2_ref[...], preferred_element_type=jnp.float32) + b2_ref[...]

        # final dropout: identity in eval mode
        o_ref[...] = (x3 + y).astype(o_ref.dtype)

    return kernel


def _build_additive_mask(B, L, attn_mask):
    """Combined (B*L, B*L) additive mask: block-diagonal batch structure folded with
    the optional user (L, L) mask.  Returns None when no mask is needed."""
    if B == 1 and attn_mask is None:
        return None
    N = B * L
    bid = jnp.arange(N, dtype=jnp.int32) // L
    same_batch = bid[:, None] == bid[None, :]
    if attn_mask is None:
        on_block = jnp.zeros((N, N), jnp.float32)
    else:
        on_block = jnp.tile(attn_mask.astype(jnp.float32), (B, B))
    return jnp.where(same_batch, on_block, jnp.float32(_NEG_INF))


def vanilla_transformer_block(x, params, attn_mask=None):
    """x: (B, L, D_MODEL) float32.  attn_mask: None or additive (L, L) mask
    (broadcast over batch and heads, as in the reference module)."""
    B, L, D = x.shape
    assert D == D_MODEL
    wq, wk, wv, gamma, beta, w1, b1, w2, b2 = params
    N = B * L

    # TODO(synk): for large B*L, add a batch grid axis (parallel, for v7x megacore)
    # instead of folding everything into one (N, N) score matrix.
    mask = _build_additive_mask(B, L, attn_mask)
    has_mask = mask is not None

    x2d = x.reshape(N, D)

    operands = [x2d]
    in_specs = [pl.BlockSpec((N, D), lambda i: (0, 0))]
    if has_mask:
        operands.append(mask)
        in_specs.append(pl.BlockSpec((N, N), lambda i: (0, 0)))
    operands += [wq, wk, wv, gamma, beta, w1, b1, w2, b2]
    in_specs += [
        pl.BlockSpec((N_HEADS, D, DIM_HEAD), lambda i: (0, 0, 0)),   # per-head Wq (scaled)
        pl.BlockSpec((N_HEADS, D, DIM_HEAD), lambda i: (0, 0, 0)),   # per-head Wk
        pl.BlockSpec((N_HEADS, D, DIM_HEAD), lambda i: (0, 0, 0)),   # per-head Wv
        pl.BlockSpec((1, D), lambda i: (0, 0)),                      # LN gamma
        pl.BlockSpec((1, D), lambda i: (0, 0)),                      # LN beta
        pl.BlockSpec((D, DFF), lambda i: (0, 0)),                    # ffn W1
        pl.BlockSpec((1, DFF), lambda i: (0, 0)),                    # ffn b1
        pl.BlockSpec((DFF, D), lambda i: (0, 0)),                    # ffn W2
        pl.BlockSpec((1, D), lambda i: (0, 0)),                      # ffn b2
    ]

    out2d = pl.pallas_call(
        _make_kernel(has_mask),
        out_shape=jax.ShapeDtypeStruct((N, D), x.dtype),
        grid=(1,),                                  # single step: whole batch at once
        in_specs=in_specs,
        out_specs=pl.BlockSpec((N, D), lambda i: (0, 0)),
        compiler_params=pltpu.CompilerParams(dimension_semantics=("arbitrary",)),
    )(*operands)
    return out2d.reshape(B, L, D)


def init_params(key):
    """Deterministic synthetic parameters (LoRA path folded into each weight)."""
    ks = iter(jax.random.split(key, 16))

    def lora_linear(in_f, out_f, with_bias=True):
        w = jax.random.normal(next(ks), (out_f, in_f), jnp.float32) * 0.02
        a = jax.random.normal(next(ks), (LORA_R, in_f), jnp.float32) * 0.02
        b = jax.random.normal(next(ks), (out_f, LORA_R), jnp.float32) * 0.02
        scaling = 1.0 / LORA_R                      # lora_alpha (=1) / r
        w_eff = (w + scaling * (b @ a)).T           # (in_f, out_f): y = x @ w_eff
        bias = (jax.random.normal(next(ks), (1, out_f), jnp.float32) * 0.02
                if with_bias else None)
        return w_eff, bias

    wqkv, _ = lora_linear(D_MODEL, 3 * D_MODEL, with_bias=False)   # qkv (bias=False)
    w1, b1 = lora_linear(D_MODEL, DFF)                             # ffn linear 1
    w2, b2 = lora_linear(DFF, D_MODEL)                             # ffn linear 2

    gamma = jnp.ones((1, D_MODEL), jnp.float32)     # nn.LayerNorm default init
    beta = jnp.zeros((1, D_MODEL), jnp.float32)

    # PyTorch column layout per head h: [Q_h | K_h | V_h] at offset h*3*dh.
    # Split host-side into per-head blocks and fold 1/sqrt(dim_head) into Q.
    wq_l, wk_l, wv_l = [], [], []
    for h in range(N_HEADS):
        base = h * 3 * DIM_HEAD
        wq_l.append(wqkv[:, base:base + DIM_HEAD] / SCALE)
        wk_l.append(wqkv[:, base + DIM_HEAD:base + 2 * DIM_HEAD])
        wv_l.append(wqkv[:, base + 2 * DIM_HEAD:base + 3 * DIM_HEAD])
    wq = jnp.stack(wq_l, axis=0)   # (H, D, dh)
    wk = jnp.stack(wk_l, axis=0)   # (H, D, dh)
    wv = jnp.stack(wv_l, axis=0)   # (H, D, dh)

    return (wq, wk, wv, gamma, beta, w1, b1, w2, b2)


if __name__ == "__main__":
    key = jax.random.PRNGKey(0)
    k_x, k_p = jax.random.split(key)

    B, L = 2, 8
    x = jax.random.normal(k_x, (B, L, D_MODEL), jnp.float32)
    params = init_params(k_p)

    # 1) batched, no user mask (block-diagonal batch mask auto-applied)
    out = jax.block_until_ready(vanilla_transformer_block(x, params, attn_mask=None))
    assert out.shape == (B, L, D_MODEL) and out.dtype == jnp.float32
    assert bool(jnp.all(jnp.isfinite(out)))

    # 2) batched, additive causal mask (exercises the user-mask fold)
    causal = jnp.where(jnp.tril(jnp.ones((L, L), bool)), 0.0, -1e9).astype(jnp.float32)
    out_m = jax.block_until_ready(vanilla_transformer_block(x, params, attn_mask=causal))
    assert out_m.shape == (B, L, D_MODEL)
    assert bool(jnp.all(jnp.isfinite(out_m)))

    # 3) B == 1, no mask: specialized kernel with the mask operand dropped entirely
    out_1 = jax.block_until_ready(
        vanilla_transformer_block(x[:1], params, attn_mask=None))
    assert out_1.shape == (1, L, D_MODEL)
    assert bool(jnp.all(jnp.isfinite(out_1)))

    print("KERNEL_OK")
</pallas_src>

<mosaic_0001>
module attributes {stable_mosaic.version = 11 : i64} {
  func.func @kernel(%arg0: i32, %arg1: memref<16x32xf32, #tpu.memory_space<vmem>>, %arg2: memref<16x16xf32, #tpu.memory_space<vmem>>, %arg3: memref<4x32x8xf32, #tpu.memory_space<vmem>>, %arg4: memref<4x32x8xf32, #tpu.memory_space<vmem>>, %arg5: memref<4x32x8xf32, #tpu.memory_space<vmem>>, %arg6: memref<1x32xf32, #tpu.memory_space<vmem>>, %arg7: memref<1x32xf32, #tpu.memory_space<vmem>>, %arg8: memref<32x64xf32, #tpu.memory_space<vmem>>, %arg9: memref<1x64xf32, #tpu.memory_space<vmem>>, %arg10: memref<64x32xf32, #tpu.memory_space<vmem>>, %arg11: memref<1x32xf32, #tpu.memory_space<vmem>>, %arg12: memref<16x32xf32, #tpu.memory_space<vmem>>) attributes {dimension_semantics = [#tpu.dimension_semantics<arbitrary>], iteration_bounds = array<i64: 1>, scalar_prefetch = 0 : i64, scratch_operands = 0 : i64, tpu.core_type = #tpu.core_type<tc>, window_params = [{pipeline_mode = #tpu.pipeline_mode<synchronous>, transform_indices = @transform_0, window_bounds = array<i64: 16, 32>}, {pipeline_mode = #tpu.pipeline_mode<synchronous>, transform_indices = @transform_1, window_bounds = array<i64: 16, 16>}, {pipeline_mode = #tpu.pipeline_mode<synchronous>, transform_indices = @transform_2, window_bounds = array<i64: 4, 32, 8>}, {pipeline_mode = #tpu.pipeline_mode<synchronous>, transform_indices = @transform_3, window_bounds = array<i64: 4, 32, 8>}, {pipeline_mode = #tpu.pipeline_mode<synchronous>, transform_indices = @transform_4, window_bounds = array<i64: 4, 32, 8>}, {pipeline_mode = #tpu.pipeline_mode<synchronous>, transform_indices = @transform_5, window_bounds = array<i64: 1, 32>}, {pipeline_mode = #tpu.pipeline_mode<synchronous>, transform_indices = @transform_6, window_bounds = array<i64: 1, 32>}, {pipeline_mode = #tpu.pipeline_mode<synchronous>, transform_indices = @transform_7, window_bounds = array<i64: 32, 64>}, {pipeline_mode = #tpu.pipeline_mode<synchronous>, transform_indices = @transform_8, window_bounds = array<i64: 1, 64>}, {pipeline_mode = #tpu.pipeline_mode<synchronous>, transform_indices = @transform_9, window_bounds = array<i64: 64, 32>}, {pipeline_mode = #tpu.pipeline_mode<synchronous>, transform_indices = @transform_10, window_bounds = array<i64: 1, 32>}, {pipeline_mode = #tpu.pipeline_mode<synchronous>, transform_indices = @transform_11, window_bounds = array<i64: 16, 32>}]} {
    %c0 = arith.constant 0 : index
    %c0_0 = arith.constant 0 : index
    %0 = vector.load %arg1[%c0, %c0_0] : memref<16x32xf32, #tpu.memory_space<vmem>>, vector<16x32xf32>
    %c0_1 = arith.constant 0 : index
    %c0_2 = arith.constant 0 : index
    %1 = vector.load %arg6[%c0_1, %c0_2] : memref<1x32xf32, #tpu.memory_space<vmem>>, vector<1x32xf32>
    %c0_3 = arith.constant 0 : index
    %c0_4 = arith.constant 0 : index
    %2 = vector.load %arg7[%c0_3, %c0_4] : memref<1x32xf32, #tpu.memory_space<vmem>>, vector<1x32xf32>
    %cst = arith.constant dense<0.000000e+00> : vector<16xf32>
    %3 = vector.multi_reduction <add>, %0, %cst [1] : vector<16x32xf32> to vector<16xf32>
    %4 = vector.shape_cast %3 : vector<16xf32> to vector<16x1xf32>
    %cst_5 = arith.constant 3.200000e+01 : f32
    %5 = vector.broadcast %cst_5 : f32 to vector<16x1xf32>
    %6 = arith.divf %4, %5 : vector<16x1xf32>
    %7 = vector.broadcast %6 : vector<16x1xf32> to vector<16x32xf32>
    %8 = arith.subf %0, %7 : vector<16x32xf32>
    %9 = arith.mulf %8, %8 : vector<16x32xf32>
    %cst_6 = arith.constant dense<0.000000e+00> : vector<16xf32>
    %10 = vector.multi_reduction <add>, %9, %cst_6 [1] : vector<16x32xf32> to vector<16xf32>
    %11 = vector.shape_cast %10 : vector<16xf32> to vector<16x1xf32>
    %cst_7 = arith.constant 3.200000e+01 : f32
    %12 = vector.broadcast %cst_7 : f32 to vector<16x1xf32>
    %13 = arith.divf %11, %12 : vector<16x1xf32>
    %14 = vector.broadcast %6 : vector<16x1xf32> to vector<16x32xf32>
    %15 = arith.subf %0, %14 : vector<16x32xf32>
    %cst_8 = arith.constant 9.99999974E-6 : f32
    %16 = vector.broadcast %cst_8 : f32 to vector<16x1xf32>
    %17 = arith.addf %13, %16 : vector<16x1xf32>
    %18 = math.rsqrt %17 : vector<16x1xf32>
    %19 = vector.broadcast %18 : vector<16x1xf32> to vector<16x32xf32>
    %20 = arith.mulf %15, %19 : vector<16x32xf32>
    %21 = vector.broadcast %1 : vector<1x32xf32> to vector<16x32xf32>
    %22 = arith.mulf %20, %21 : vector<16x32xf32>
    %23 = vector.broadcast %2 : vector<1x32xf32> to vector<16x32xf32>
    %24 = arith.addf %22, %23 : vector<16x32xf32>
    %c0_9 = arith.constant 0 : index
    %c0_10 = arith.constant 0 : index
    %25 = vector.load %arg2[%c0_9, %c0_10] : memref<16x16xf32, #tpu.memory_space<vmem>>, vector<16x16xf32>
    %c0_11 = arith.constant 0 : index
    %c0_12 = arith.constant 0 : index
    %c0_13 = arith.constant 0 : index
    %26 = vector.load %arg3[%c0_11, %c0_12, %c0_13] : memref<4x32x8xf32, #tpu.memory_space<vmem>>, vector<1x32x8xf32>
    %27 = vector.shape_cast %26 : vector<1x32x8xf32> to vector<32x8xf32>
    %cst_14 = arith.constant dense<0.000000e+00> : vector<16x8xf32>
    %28 = tpu.matmul %24, %27, %cst_14 {dimension_numbers = #tpu.dot_dimension_numbers<[1], [0], [0], [1], [0, 0, 1, 1], [], []>} : vector<16x32xf32>, vector<32x8xf32>, vector<16x8xf32> -> vector<16x8xf32>
    %c0_15 = arith.constant 0 : index
    %c0_16 = arith.constant 0 : index
    %c0_17 = arith.constant 0 : index
    %29 = vector.load %arg4[%c0_15, %c0_16, %c0_17] : memref<4x32x8xf32, #tpu.memory_space<vmem>>, vector<1x32x8xf32>
    %30 = vector.shape_cast %29 : vector<1x32x8xf32> to vector<32x8xf32>
    %cst_18 = arith.constant dense<0.000000e+00> : vector<16x8xf32>
    %31 = tpu.matmul %24, %30, %cst_18 {dimension_numbers = #tpu.dot_dimension_numbers<[1], [0], [0], [1], [0, 0, 1, 1], [], []>} : vector<16x32xf32>, vector<32x8xf32>, vector<16x8xf32> -> vector<16x8xf32>
    %c0_19 = arith.constant 0 : index
    %c0_20 = arith.constant 0 : index
    %c0_21 = arith.constant 0 : index
    %32 = vector.load %arg5[%c0_19, %c0_20, %c0_21] : memref<4x32x8xf32, #tpu.memory_space<vmem>>, vector<1x32x8xf32>
    %33 = vector.shape_cast %32 : vector<1x32x8xf32> to vector<32x8xf32>
    %cst_22 = arith.constant dense<0.000000e+00> : vector<16x8xf32>
    %34 = tpu.matmul %24, %33, %cst_22 {dimension_numbers = #tpu.dot_dimension_numbers<[1], [0], [0], [1], [0, 0, 1, 1], [], []>} : vector<16x32xf32>, vector<32x8xf32>, vector<16x8xf32> -> vector<16x8xf32>
    %cst_23 = arith.constant dense<0.000000e+00> : vector<16x16xf32>
    %35 = tpu.matmul %28, %31, %cst_23 {dimension_numbers = #tpu.dot_dimension_numbers<[1], [1], [0], [0], [0, 0, 1, 0], [], []>} : vector<16x8xf32>, vector<16x8xf32>, vector<16x16xf32> -> vector<16x16xf32>
    %36 = arith.addf %35, %25 : vector<16x16xf32>
    %cst_24 = arith.constant dense<0xFF800000> : vector<16xf32>
    %37 = vector.multi_reduction <maximumf>, %36, %cst_24 [1] : vector<16x16xf32> to vector<16xf32>
    %38 = vector.shape_cast %37 : vector<16xf32> to vector<16x1xf32>
    %39 = vector.broadcast %38 : vector<16x1xf32> to vector<16x16xf32>
    %40 = arith.subf %36, %39 : vector<16x16xf32>
    %41 = math.exp %40 : vector<16x16xf32>
    %cst_25 = arith.constant dense<0.000000e+00> : vector<16xf32>
    %42 = vector.multi_reduction <add>, %41, %cst_25 [1] : vector<16x16xf32> to vector<16xf32>
    %43 = vector.shape_cast %42 : vector<16xf32> to vector<16x1xf32>
    %44 = tpu.reciprocal %43 {approx = true} : vector<16x1xf32> -> vector<16x1xf32>
    %cst_26 = arith.constant dense<0.000000e+00> : vector<16x8xf32>
    %45 = tpu.matmul %41, %34, %cst_26 {dimension_numbers = #tpu.dot_dimension_numbers<[1], [0], [0], [1], [0, 0, 1, 1], [], []>} : vector<16x16xf32>, vector<16x8xf32>, vector<16x8xf32> -> vector<16x8xf32>
    %46 = vector.broadcast %44 : vector<16x1xf32> to vector<16x8xf32>
    %47 = arith.mulf %45, %46 : vector<16x8xf32>
    %c1 = arith.constant 1 : index
    %c0_27 = arith.constant 0 : index
    %c0_28 = arith.constant 0 : index
    %48 = vector.load %arg3[%c1, %c0_27, %c0_28] : memref<4x32x8xf32, #tpu.memory_space<vmem>>, vector<1x32x8xf32>
    %49 = vector.shape_cast %48 : vector<1x32x8xf32> to vector<32x8xf32>
    %cst_29 = arith.constant dense<0.000000e+00> : vector<16x8xf32>
    %50 = tpu.matmul %24, %49, %cst_29 {dimension_numbers = #tpu.dot_dimension_numbers<[1], [0], [0], [1], [0, 0, 1, 1], [], []>} : vector<16x32xf32>, vector<32x8xf32>, vector<16x8xf32> -> vector<16x8xf32>
    %c1_30 = arith.constant 1 : index
    %c0_31 = arith.constant 0 : index
    %c0_32 = arith.constant 0 : index
    %51 = vector.load %arg4[%c1_30, %c0_31, %c0_32] : memref<4x32x8xf32, #tpu.memory_space<vmem>>, vector<1x32x8xf32>
    %52 = vector.shape_cast %51 : vector<1x32x8xf32> to vector<32x8xf32>
    %cst_33 = arith.constant dense<0.000000e+00> : vector<16x8xf32>
    %53 = tpu.matmul %24, %52, %cst_33 {dimension_numbers = #tpu.dot_dimension_numbers<[1], [0], [0], [1], [0, 0, 1, 1], [], []>} : vector<16x32xf32>, vector<32x8xf32>, vector<16x8xf32> -> vector<16x8xf32>
    %c1_34 = arith.constant 1 : index
    %c0_35 = arith.constant 0 : index
    %c0_36 = arith.constant 0 : index
    %54 = vector.load %arg5[%c1_34, %c0_35, %c0_36] : memref<4x32x8xf32, #tpu.memory_space<vmem>>, vector<1x32x8xf32>
    %55 = vector.shape_cast %54 : vector<1x32x8xf32> to vector<32x8xf32>
    %cst_37 = arith.constant dense<0.000000e+00> : vector<16x8xf32>
    %56 = tpu.matmul %24, %55, %cst_37 {dimension_numbers = #tpu.dot_dimension_numbers<[1], [0], [0], [1], [0, 0, 1, 1], [], []>} : vector<16x32xf32>, vector<32x8xf32>, vector<16x8xf32> -> vector<16x8xf32>
    %cst_38 = arith.constant dense<0.000000e+00> : vector<16x16xf32>
    %57 = tpu.matmul %50, %53, %cst_38 {dimension_numbers = #tpu.dot_dimension_numbers<[1], [1], [0], [0], [0, 0, 1, 0], [], []>} : vector<16x8xf32>, vector<16x8xf32>, vector<16x16xf32> -> vector<16x16xf32>
    %58 = arith.addf %57, %25 : vector<16x16xf32>
    %cst_39 = arith.constant dense<0xFF800000> : vector<16xf32>
    %59 = vector.multi_reduction <maximumf>, %58, %cst_39 [1] : vector<16x16xf32> to vector<16xf32>
    %60 = vector.shape_cast %59 : vector<16xf32> to vector<16x1xf32>
    %61 = vector.broadcast %60 : vector<16x1xf32> to vector<16x16xf32>
    %62 = arith.subf %58, %61 : vector<16x16xf32>
    %63 = math.exp %62 : vector<16x16xf32>
    %cst_40 = arith.constant dense<0.000000e+00> : vector<16xf32>
    %64 = vector.multi_reduction <add>, %63, %cst_40 [1] : vector<16x16xf32> to vector<16xf32>
    %65 = vector.shape_cast %64 : vector<16xf32> to vector<16x1xf32>
    %66 = tpu.reciprocal %65 {approx = true} : vector<16x1xf32> -> vector<16x1xf32>
    %cst_41 = arith.constant dense<0.000000e+00> : vector<16x8xf32>
    %67 = tpu.matmul %63, %56, %cst_41 {dimension_numbers = #tpu.dot_dimension_numbers<[1], [0], [0], [1], [0, 0, 1, 1], [], []>} : vector<16x16xf32>, vector<16x8xf32>, vector<16x8xf32> -> vector<16x8xf32>
    %68 = vector.broadcast %66 : vector<16x1xf32> to vector<16x8xf32>
    %69 = arith.mulf %67, %68 : vector<16x8xf32>
    %c2 = arith.constant 2 : index
    %c0_42 = arith.constant 0 : index
    %c0_43 = arith.constant 0 : index
    %70 = vector.load %arg3[%c2, %c0_42, %c0_43] : memref<4x32x8xf32, #tpu.memory_space<vmem>>, vector<1x32x8xf32>
    %71 = vector.shape_cast %70 : vector<1x32x8xf32> to vector<32x8xf32>
    %cst_44 = arith.constant dense<0.000000e+00> : vector<16x8xf32>
    %72 = tpu.matmul %24, %71, %cst_44 {dimension_numbers = #tpu.dot_dimension_numbers<[1], [0], [0], [1], [0, 0, 1, 1], [], []>} : vector<16x32xf32>, vector<32x8xf32>, vector<16x8xf32> -> vector<16x8xf32>
    %c2_45 = arith.constant 2 : index
    %c0_46 = arith.constant 0 : index
    %c0_47 = arith.constant 0 : index
    %73 = vector.load %arg4[%c2_45, %c0_46, %c0_47] : memref<4x32x8xf32, #tpu.memory_space<vmem>>, vector<1x32x8xf32>
    %74 = vector.shape_cast %73 : vector<1x32x8xf32> to vector<32x8xf32>
    %cst_48 = arith.constant dense<0.000000e+00> : vector<16x8xf32>
    %75 = tpu.matmul %24, %74, %cst_48 {dimension_numbers = #tpu.dot_dimension_numbers<[1], [0], [0], [1], [0, 0, 1, 1], [], []>} : vector<16x32xf32>, vector<32x8xf32>, vector<16x8xf32> -> vector<16x8xf32>
    %c2_49 = arith.constant 2 : index
    %c0_50 = arith.constant 0 : index
    %c0_51 = arith.constant 0 : index
    %76 = vector.load %arg5[%c2_49, %c0_50, %c0_51] : memref<4x32x8xf32, #tpu.memory_space<vmem>>, vector<1x32x8xf32>
    %77 = vector.shape_cast %76 : vector<1x32x8xf32> to vector<32x8xf32>
    %cst_52 = arith.constant dense<0.000000e+00> : vector<16x8xf32>
    %78 = tpu.matmul %24, %77, %cst_52 {dimension_numbers = #tpu.dot_dimension_numbers<[1], [0], [0], [1], [0, 0, 1, 1], [], []>} : vector<16x32xf32>, vector<32x8xf32>, vector<16x8xf32> -> vector<16x8xf32>
    %cst_53 = arith.constant dense<0.000000e+00> : vector<16x16xf32>
    %79 = tpu.matmul %72, %75, %cst_53 {dimension_numbers = #tpu.dot_dimension_numbers<[1], [1], [0], [0], [0, 0, 1, 0], [], []>} : vector<16x8xf32>, vector<16x8xf32>, vector<16x16xf32> -> vector<16x16xf32>
    %80 = arith.addf %79, %25 : vector<16x16xf32>
    %cst_54 = arith.constant dense<0xFF800000> : vector<16xf32>
    %81 = vector.multi_reduction <maximumf>, %80, %cst_54 [1] : vector<16x16xf32> to vector<16xf32>
    %82 = vector.shape_cast %81 : vector<16xf32> to vector<16x1xf32>
    %83 = vector.broadcast %82 : vector<16x1xf32> to vector<16x16xf32>
    %84 = arith.subf %80, %83 : vector<16x16xf32>
    %85 = math.exp %84 : vector<16x16xf32>
    %cst_55 = arith.constant dense<0.000000e+00> : vector<16xf32>
    %86 = vector.multi_reduction <add>, %85, %cst_55 [1] : vector<16x16xf32> to vector<16xf32>
    %87 = vector.shape_cast %86 : vector<16xf32> to vector<16x1xf32>
    %88 = tpu.reciprocal %87 {approx = true} : vector<16x1xf32> -> vector<16x1xf32>
    %cst_56 = arith.constant dense<0.000000e+00> : vector<16x8xf32>
    %89 = tpu.matmul %85, %78, %cst_56 {dimension_numbers = #tpu.dot_dimension_numbers<[1], [0], [0], [1], [0, 0, 1, 1], [], []>} : vector<16x16xf32>, vector<16x8xf32>, vector<16x8xf32> -> vector<16x8xf32>
    %90 = vector.broadcast %88 : vector<16x1xf32> to vector<16x8xf32>
    %91 = arith.mulf %89, %90 : vector<16x8xf32>
    %c3 = arith.constant 3 : index
    %c0_57 = arith.constant 0 : index
    %c0_58 = arith.constant 0 : index
    %92 = vector.load %arg3[%c3, %c0_57, %c0_58] : memref<4x32x8xf32, #tpu.memory_space<vmem>>, vector<1x32x8xf32>
    %93 = vector.shape_cast %92 : vector<1x32x8xf32> to vector<32x8xf32>
    %cst_59 = arith.constant dense<0.000000e+00> : vector<16x8xf32>
    %94 = tpu.matmul %24, %93, %cst_59 {dimension_numbers = #tpu.dot_dimension_numbers<[1], [0], [0], [1], [0, 0, 1, 1], [], []>} : vector<16x32xf32>, vector<32x8xf32>, vector<16x8xf32> -> vector<16x8xf32>
    %c3_60 = arith.constant 3 : index
    %c0_61 = arith.constant 0 : index
    %c0_62 = arith.constant 0 : index
    %95 = vector.load %arg4[%c3_60, %c0_61, %c0_62] : memref<4x32x8xf32, #tpu.memory_space<vmem>>, vector<1x32x8xf32>
    %96 = vector.shape_cast %95 : vector<1x32x8xf32> to vector<32x8xf32>
    %cst_63 = arith.constant dense<0.000000e+00> : vector<16x8xf32>
    %97 = tpu.matmul %24, %96, %cst_63 {dimension_numbers = #tpu.dot_dimension_numbers<[1], [0], [0], [1], [0, 0, 1, 1], [], []>} : vector<16x32xf32>, vector<32x8xf32>, vector<16x8xf32> -> vector<16x8xf32>
    %c3_64 = arith.constant 3 : index
    %c0_65 = arith.constant 0 : index
    %c0_66 = arith.constant 0 : index
    %98 = vector.load %arg5[%c3_64, %c0_65, %c0_66] : memref<4x32x8xf32, #tpu.memory_space<vmem>>, vector<1x32x8xf32>
    %99 = vector.shape_cast %98 : vector<1x32x8xf32> to vector<32x8xf32>
    %cst_67 = arith.constant dense<0.000000e+00> : vector<16x8xf32>
    %100 = tpu.matmul %24, %99, %cst_67 {dimension_numbers = #tpu.dot_dimension_numbers<[1], [0], [0], [1], [0, 0, 1, 1], [], []>} : vector<16x32xf32>, vector<32x8xf32>, vector<16x8xf32> -> vector<16x8xf32>
    %cst_68 = arith.constant dense<0.000000e+00> : vector<16x16xf32>
    %101 = tpu.matmul %94, %97, %cst_68 {dimension_numbers = #tpu.dot_dimension_numbers<[1], [1], [0], [0], [0, 0, 1, 0], [], []>} : vector<16x8xf32>, vector<16x8xf32>, vector<16x16xf32> -> vector<16x16xf32>
    %102 = arith.addf %101, %25 : vector<16x16xf32>
    %cst_69 = arith.constant dense<0xFF800000> : vector<16xf32>
    %103 = vector.multi_reduction <maximumf>, %102, %cst_69 [1] : vector<16x16xf32> to vector<16xf32>
    %104 = vector.shape_cast %103 : vector<16xf32> to vector<16x1xf32>
    %105 = vector.broadcast %104 : vector<16x1xf32> to vector<16x16xf32>
    %106 = arith.subf %102, %105 : vector<16x16xf32>
    %107 = math.exp %106 : vector<16x16xf32>
    %cst_70 = arith.constant dense<0.000000e+00> : vector<16xf32>
    %108 = vector.multi_reduction <add>, %107, %cst_70 [1] : vector<16x16xf32> to vector<16xf32>
    %109 = vector.shape_cast %108 : vector<16xf32> to vector<16x1xf32>
    %110 = tpu.reciprocal %109 {approx = true} : vector<16x1xf32> -> vector<16x1xf32>
    %cst_71 = arith.constant dense<0.000000e+00> : vector<16x8xf32>
    %111 = tpu.matmul %107, %100, %cst_71 {dimension_numbers = #tpu.dot_dimension_numbers<[1], [0], [0], [1], [0, 0, 1, 1], [], []>} : vector<16x16xf32>, vector<16x8xf32>, vector<16x8xf32> -> vector<16x8xf32>
    %112 = vector.broadcast %110 : vector<16x1xf32> to vector<16x8xf32>
    %113 = arith.mulf %111, %112 : vector<16x8xf32>
    %114 = tpu.concatenate %47, %69, %91, %113 in 1 : vector<16x8xf32>, vector<16x8xf32>, vector<16x8xf32>, vector<16x8xf32> -> vector<16x32xf32>
    %115 = arith.addf %114, %24 : vector<16x32xf32>
    %cst_72 = arith.constant dense<0.000000e+00> : vector<16xf32>
    %116 = vector.multi_reduction <add>, %115, %cst_72 [1] : vector<16x32xf32> to vector<16xf32>
    %117 = vector.shape_cast %116 : vector<16xf32> to vector<16x1xf32>
    %cst_73 = arith.constant 3.200000e+01 : f32
    %118 = vector.broadcast %cst_73 : f32 to vector<16x1xf32>
    %119 = arith.divf %117, %118 : vector<16x1xf32>
    %120 = vector.broadcast %119 : vector<16x1xf32> to vector<16x32xf32>
    %121 = arith.subf %115, %120 : vector<16x32xf32>
    %122 = arith.mulf %121, %121 : vector<16x32xf32>
    %cst_74 = arith.constant dense<0.000000e+00> : vector<16xf32>
    %123 = vector.multi_reduction <add>, %122, %cst_74 [1] : vector<16x32xf32> to vector<16xf32>
    %124 = vector.shape_cast %123 : vector<16xf32> to vector<16x1xf32>
    %cst_75 = arith.constant 3.200000e+01 : f32
    %125 = vector.broadcast %cst_75 : f32 to vector<16x1xf32>
    %126 = arith.divf %124, %125 : vector<16x1xf32>
    %127 = vector.broadcast %119 : vector<16x1xf32> to vector<16x32xf32>
    %128 = arith.subf %115, %127 : vector<16x32xf32>
    %cst_76 = arith.constant 9.99999974E-6 : f32
    %129 = vector.broadcast %cst_76 : f32 to vector<16x1xf32>
    %130 = arith.addf %126, %129 : vector<16x1xf32>
    %131 = math.rsqrt %130 : vector<16x1xf32>
    %132 = vector.broadcast %131 : vector<16x1xf32> to vector<16x32xf32>
    %133 = arith.mulf %128, %132 : vector<16x32xf32>
    %134 = vector.broadcast %1 : vector<1x32xf32> to vector<16x32xf32>
    %135 = arith.mulf %133, %134 : vector<16x32xf32>
    %136 = vector.broadcast %2 : vector<1x32xf32> to vector<16x32xf32>
    %137 = arith.addf %135, %136 : vector<16x32xf32>
    %c0_77 = arith.constant 0 : index
    %c0_78 = arith.constant 0 : index
    %138 = vector.load %arg8[%c0_77, %c0_78] : memref<32x64xf32, #tpu.memory_space<vmem>>, vector<32x64xf32>
    %cst_79 = arith.constant dense<0.000000e+00> : vector<16x64xf32>
    %139 = tpu.matmul %137, %138, %cst_79 {dimension_numbers = #tpu.dot_dimension_numbers<[1], [0], [0], [1], [0, 0, 1, 1], [], []>} : vector<16x32xf32>, vector<32x64xf32>, vector<16x64xf32> -> vector<16x64xf32>
    %c0_80 = arith.constant 0 : index
    %c0_81 = arith.constant 0 : index
    %140 = vector.load %arg9[%c0_80, %c0_81] : memref<1x64xf32, #tpu.memory_space<vmem>>, vector<1x64xf32>
    %141 = vector.broadcast %140 : vector<1x64xf32> to vector<16x64xf32>
    %142 = arith.addf %139, %141 : vector<16x64xf32>
    %cst_82 = arith.constant 5.000000e-01 : f32
    %143 = vector.broadcast %cst_82 : f32 to vector<16x64xf32>
    %144 = arith.mulf %143, %142 : vector<16x64xf32>
    %cst_83 = arith.constant 0.707106769 : f32
    %145 = vector.broadcast %cst_83 : f32 to vector<16x64xf32>
    %146 = arith.mulf %142, %145 : vector<16x64xf32>
    %147 = math.erf %146 : vector<16x64xf32>
    %cst_84 = arith.constant 1.000000e+00 : f32
    %148 = vector.broadcast %cst_84 : f32 to vector<16x64xf32>
    %149 = arith.addf %148, %147 : vector<16x64xf32>
    %150 = arith.mulf %144, %149 : vector<16x64xf32>
    %c0_85 = arith.constant 0 : index
    %c0_86 = arith.constant 0 : index
    %151 = vector.load %arg10[%c0_85, %c0_86] : memref<64x32xf32, #tpu.memory_space<vmem>>, vector<64x32xf32>
    %cst_87 = arith.constant dense<0.000000e+00> : vector<16x32xf32>
    %152 = tpu.matmul %150, %151, %cst_87 {dimension_numbers = #tpu.dot_dimension_numbers<[1], [0], [0], [1], [0, 0, 1, 1], [], []>} : vector<16x64xf32>, vector<64x32xf32>, vector<16x32xf32> -> vector<16x32xf32>
    %c0_88 = arith.constant 0 : index
    %c0_89 = arith.constant 0 : index
    %153 = vector.load %arg11[%c0_88, %c0_89] : memref<1x32xf32, #tpu.memory_space<vmem>>, vector<1x32xf32>
    %154 = vector.broadcast %153 : vector<1x32xf32> to vector<16x32xf32>
    %155 = arith.addf %152, %154 : vector<16x32xf32>
    %156 = arith.addf %137, %155 : vector<16x32xf32>
    %c0_90 = arith.constant 0 : index
    %c0_91 = arith.constant 0 : index
    %157 = vector.load %arg12[%c0_90, %c0_91] : memref<16x32xf32, #tpu.memory_space<vmem>>, vector<16x32xf32>
    tpu.vector_store %arg12[%c0_90, %c0_91], %156 {strides = array<i32>} : memref<16x32xf32, #tpu.memory_space<vmem>>, vector<16x32xf32>,
    return
  }
  func.func @transform_0(%arg0: i32) -> (i32, i32) {
    %c0_i32 = arith.constant 0 : i32
    %c0_i32_0 = arith.constant 0 : i32
    %c0_i32_1 = arith.constant 0 : i32
    return %c0_i32, %c0_i32_0 : i32, i32
  }
  func.func @transform_1(%arg0: i32) -> (i32, i32) {
    %c0_i32 = arith.constant 0 : i32
    %c0_i32_0 = arith.constant 0 : i32
    %c0_i32_1 = arith.constant 0 : i32
    return %c0_i32, %c0_i32_0 : i32, i32
  }
  func.func @transform_2(%arg0: i32) -> (i32, i32, i32) {
    %c0_i32 = arith.constant 0 : i32
    %c0_i32_0 = arith.constant 0 : i32
    %c0_i32_1 = arith.constant 0 : i32
    %c0_i32_2 = arith.constant 0 : i32
    return %c0_i32, %c0_i32_0, %c0_i32_1 : i32, i32, i32
  }
  func.func @transform_3(%arg0: i32) -> (i32, i32, i32) {
    %c0_i32 = arith.constant 0 : i32
    %c0_i32_0 = arith.constant 0 : i32
    %c0_i32_1 = arith.constant 0 : i32
    %c0_i32_2 = arith.constant 0 : i32
    return %c0_i32, %c0_i32_0, %c0_i32_1 : i32, i32, i32
  }
  func.func @transform_4(%arg0: i32) -> (i32, i32, i32) {
    %c0_i32 = arith.constant 0 : i32
    %c0_i32_0 = arith.constant 0 : i32
    %c0_i32_1 = arith.constant 0 : i32
    %c0_i32_2 = arith.constant 0 : i32
    return %c0_i32, %c0_i32_0, %c0_i32_1 : i32, i32, i32
  }
  func.func @transform_5(%arg0: i32) -> (i32, i32) {
    %c0_i32 = arith.constant 0 : i32
    %c0_i32_0 = arith.constant 0 : i32
    %c0_i32_1 = arith.constant 0 : i32
    return %c0_i32, %c0_i32_0 : i32, i32
  }
  func.func @transform_6(%arg0: i32) -> (i32, i32) {
    %c0_i32 = arith.constant 0 : i32
    %c0_i32_0 = arith.constant 0 : i32
    %c0_i32_1 = arith.constant 0 : i32
    return %c0_i32, %c0_i32_0 : i32, i32
  }
  func.func @transform_7(%arg0: i32) -> (i32, i32) {
    %c0_i32 = arith.constant 0 : i32
    %c0_i32_0 = arith.constant 0 : i32
    %c0_i32_1 = arith.constant 0 : i32
    return %c0_i32, %c0_i32_0 : i32, i32
  }
  func.func @transform_8(%arg0: i32) -> (i32, i32) {
    %c0_i32 = arith.constant 0 : i32
    %c0_i32_0 = arith.constant 0 : i32
    %c0_i32_1 = arith.constant 0 : i32
    return %c0_i32, %c0_i32_0 : i32, i32
  }
  func.func @transform_9(%arg0: i32) -> (i32, i32) {
    %c0_i32 = arith.constant 0 : i32
    %c0_i32_0 = arith.constant 0 : i32
    %c0_i32_1 = arith.constant 0 : i32
    return %c0_i32, %c0_i32_0 : i32, i32
  }
  func.func @transform_10(%arg0: i32) -> (i32, i32) {
    %c0_i32 = arith.constant 0 : i32
    %c0_i32_0 = arith.constant 0 : i32
    %c0_i32_1 = arith.constant 0 : i32
    return %c0_i32, %c0_i32_0 : i32, i32
  }
  func.func @transform_11(%arg0: i32) -> (i32, i32) {
    %c0_i32 = arith.constant 0 : i32
    %c0_i32_0 = arith.constant 0 : i32
    %c0_i32_1 = arith.constant 0 : i32
    return %c0_i32, %c0_i32_0 : i32, i32
  }
}

</mosaic_0001>

<bundles_post_ra>
// kernel: tpu_custom_call.1
= control target key start
LH: loop header
LB: loop body
LE: loop exit
PB: predicated region body
PF: predicated region fallthrough
CT: control target
= control target key end

     0   :  { %vm43_vm0 = vcmask 261120   ;;  %s3222_s0 = inlined_call_operand.vmem [shape: f32[16,32], index: 0, kind: input, shape index: {}]   ;;  %s3223_s1 = inlined_call_operand.vmem [shape: f32[16,16], index: 1, kind: input, shape index: {}]   ;;  %s3224_s2 = inlined_call_operand.vmem [shape: f32[4,32,8], index: 2, kind: input, shape index: {}]   ;;  %s3225_s3 = inlined_call_operand.vmem [shape: f32[4,32,8], index: 3, kind: input, shape index: {}]   ;;  %s3226_s4 = inlined_call_operand.vmem [shape: f32[4,32,8], index: 4, kind: input, shape index: {}]   ;;  %s3227_s5 = inlined_call_operand.vmem [shape: f32[1,32], index: 5, kind: input, shape index: {}]   ;;  %s3228_s6 = inlined_call_operand.vmem [shape: f32[1,32], index: 6, kind: input, shape index: {}]   ;;  %s3229_s7 = inlined_call_operand.vmem [shape: f32[32,64], index: 7, kind: input, shape index: {}]   ;;  %s3230_s8 = inlined_call_operand.vmem [shape: f32[1,64], index: 8, kind: input, shape index: {}]   ;;  %s3231_s9 = inlined_call_operand.vmem [shape: f32[64,32], index: 9, kind: input, shape index: {}]   ;;  %s3232_s10 = inlined_call_operand.vmem [shape: f32[1,32], index: 10, kind: input, shape index: {}]   ;;  %s3233_s11 = inlined_call_operand.hbm [shape: f32[16,32], index: 11, kind: output, shape index: {}]  }
   0x1   :  { %v39_v0 = vld [vmem:[%s3222_s0] sm:$0xff]  ;;  %v40_v1 = vld [vmem:[%s3222_s0 + $0x8] sm:$0xff] }
   0x2   :  { %16 = vsyncpa [#allocation3], 0  ;;  %v44_v2 = vsel %vm43_vm0, %v39_v0, 0.0  ;;  %v47_v3 = vsel %vm43_vm0, %v40_v1, 0.0  ;;  %v89_v14 = vld [vmem:[%s3224_s2] sm:$0xff]  ;;  %v90_v15 = vld [vmem:[%s3224_s2 + $0x8] sm:$0xff] }
   0x3   :  { %45 = vadd.xlane.f32.xlu0 %v44_v2  ;;  %v2526_v16 = vpack.c.bf16 %v90_v15, %v89_v14  ;;  %v174_v17 = vld [vmem:[%s3225_s3] sm:$0xff]  ;;  %v175_v18 = vld [vmem:[%s3225_s3 + $0x8] sm:$0xff]  ;;  %v91_v20 = vld [vmem:[%s3224_s2 + $0x10] sm:$0xff]  ;;  %vm332_vm1 = vcmask 64512   ;;  %vm420_vm3 = vcmask 130048   ;;  %s2761_s13 = smov 24  }
   0x4   :  { %v2534_v19 = vpack.c.bf16 %v175_v18, %v174_v17  ;;  %v92_v21 = vld [vmem:[%s3224_s2 + $0x18] sm:$0xff]  ;;  %v176_v23 = vld [vmem:[%s3225_s3 + $0x10] sm:$0xff]  ;;  %v253_v26 = vld [vmem:[%s3226_s4] sm:$0xff]  ;;  %vm1842_vm4 = vcmask 195584   ;;  %vm1994_vm5 = vcmask 523264   ;;  %s2762_s14 = smov [#allocation2]  }
   0x5   :  { %2527 = vmatprep.subr.bf16.mxu0 %v2526_v16  ;;  %v2530_v22 = vpack.c.bf16 %v92_v21, %v91_v20  ;;  %v177_v24 = vld [vmem:[%s3225_s3 + $0x18] sm:$0xff]  ;;  %v254_v27 = vld [vmem:[%s3226_s4 + $0x8] sm:$0xff]  ;;  %v2867_v36 = vld [vmem:[%s3227_s5] ss:$0 sm:$0xff]  ;;  %s2085_s15 = sshll.u32 %s2762_s14, 4  ;;  %s2086_s15 = int_to_ptr.vmem [resolvable:$true] %s2085_s15 }
   0x6   :  { %2529 = vmatpush3.bf16.msra.mxu0 %v2526_v16  ;;  %2535 = vmatprep.subr.bf16.mxu1 %v2534_v19  ;;  %v2538_v25 = vpack.c.bf16 %v177_v24, %v176_v23  ;;  %v2542_v28 = vpack.c.bf16 %v254_v27, %v253_v26  ;;  %v2872_v38 = vld [vmem:[%s3228_s6] ss:$0 sm:$0xff]  ;;  %v255_v43 = vld [vmem:[%s3226_s4 + $0x10] sm:$0xff]  ;;  %v256_v44 = vld [vmem:[%s3226_s4 + $0x18] sm:$0xff]  ;;  %s2735_s16 = scalar_lea.vmem %s2086_s15, 256  ;;  %p2740_p1 = scmp.lt.s32.totalorder %s2086_s15, %s2086_s15 }
   0x7   :  { %48 = vadd.xlane.f32.xlu0 %v47_v3  ;;  %2537 = vmatpush3.bf16.msra.mxu1 %v2534_v19  ;;  %v2546_v47 = vpack.c.bf16 %v256_v44, %v255_v43  ;;  %v2110_v48 = vld [vmem:[%s3224_s2 + $0x20] sm:$0xff]  ;;  %v2111_v49 = vld [vmem:[%s3224_s2 + $0x28] sm:$0xff]  ;;  %vm2908_vm2 = vmpackc.low %vm332_vm1, %vm332_vm1  ;;  %p2736_p0 = scmp.ne.s32.totalorder %s2086_s15, %s2735_s16  ;;  %p2741_p2 = scmp.lt.s32.totalorder %s2735_s16, %s2735_s16 }
   0x8   :  { %2531 = vmatprep.subr.bf16.mxu0 %v2530_v22  ;;  %2539 = vmatprep.subr.bf16.mxu1 %v2538_v25  ;;  %v2560_v56 = vpack.c.bf16 %v2111_v49, %v2110_v48  ;;  %v2112_v57 = vld [vmem:[%s3224_s2 + $0x30] sm:$0xff]  ;;  %v2113_v58 = vld [vmem:[%s3224_s2 + $0x38] sm:$0xff]  ;;  %v2122_v63 = vld [vmem:[%s3226_s4 + $0x20] sm:$0xff] }
   0x9   :  { %v2564_v62 = vpack.c.bf16 %v2113_v58, %v2112_v57  ;;  %v2124_v2 = vld [vmem:[%s3226_s4 + $0x30] sm:$0xff]  ;;  %v2125_v3 = vld [vmem:[%s3226_s4 + $0x38] sm:$0xff]  ;;  %v2116_v27 = vld [vmem:[%s3225_s3 + $0x20] sm:$0xff]  ;;  %p2742_p3 = por %p2741_p2, %p2740_p1 }
   0xa   :  { %2533 = vmatpush3.bf16.msra.mxu0 %v2530_v22  ;;  %v2134_v57 = vld [vmem:[%s3224_s2 + $0x40] sm:$0xff]  ;;  %v2135_v58 = vld [vmem:[%s3224_s2 + $0x48] sm:$0xff] }
   0xb   :  { %2541 = vmatpush3.bf16.msra.mxu1 %v2538_v25  ;;  %2543 = vmatprep.subr.bf16.mxu0 %v2542_v28  ;;  %p2743_p4 = pnand %p2742_p3, %p2736_p0 }
  0x90   :  { %v46_v4 = vpop.xlane.xlu0 %45 }
  0x91   :  { %v51_v5 = vmul.f32 0.03125, %v46_v4  ;;  %v2580_v4 = vpack.c.bf16 %v2125_v3, %v2124_v2  ;;  %v2136_v2 = vld [vmem:[%s3224_s2 + $0x50] sm:$0xff]  ;;  %v2137_v3 = vld [vmem:[%s3224_s2 + $0x58] sm:$0xff] }
  0x93   :  { %v53_v6 = vsub.f32 %v39_v0, %v51_v5  ;;  %v2123_v0 = vld [vmem:[%s3226_s4 + $0x28] sm:$0xff]  ;;  %v2140_v5 = vld [vmem:[%s3225_s3 + $0x40] sm:$0xff] }
  0x94   :  { %v49_v7 = vpop.xlane.xlu0 %48 }
  0x95   :  { %v52_v8 = vmul.f32 0.03125, %v49_v7  ;;  %v55_v9 = vmul.f32 %v53_v6, %v53_v6 }
  0x97   :  { %v54_v10 = vsub.f32 %v40_v1, %v52_v8  ;;  %v57_v11 = vsel %vm43_vm0, %v55_v9, 0.0  ;;  %v2576_v1 = vpack.c.bf16 %v2123_v0, %v2122_v63  ;;  %v2142_v8 = vld [vmem:[%s3225_s3 + $0x50] sm:$0xff]  ;;  %v2143_v9 = vld [vmem:[%s3225_s3 + $0x58] sm:$0xff] }
  0x98   :  { %58 = vadd.xlane.f32.xlu1 %v57_v11  ;;  %v2963_v11 = vld [vmem:[%s3223_s1 + $0x8] sm:$0xff] }
  0x99   :  { %v56_v12 = vmul.f32 %v54_v10, %v54_v10 }
  0x9b   :  { %v60_v13 = vsel %vm43_vm0, %v56_v12, 0.0  ;;  %v2968_v12 = vld [vmem:[%s3223_s1] sm:$0xff]  ;;  %s2760_s1 = smov 16  }
  0x9c   :  { %61 = vadd.xlane.f32.xlu1 %v60_v13 }
 0x125   :  { %v59_v29 = vpop.xlane.xlu1 %58 }
 0x126   :  { %v63_v30 = vmul.f32 0.03125, %v59_v29 }
 0x128   :  { %v65_v31 = vadd.f32 1e-05, %v63_v30 }
 0x129   :  { %v62_v32 = vpop.xlane.xlu1 %61 }
 0x12a   :  { %2691 = vrsqrt.f32 %v65_v31  ;;  %v64_v33 = vmul.f32 0.03125, %v62_v32 }
 0x12c   :  { %v66_v34 = vadd.f32 1e-05, %v64_v33 }
 0x12e   :  { %2693 = vrsqrt.f32 %v66_v34 }
 0x134   :  { %v2692_v35 = vpop.eup %2691 }
 0x135   :  { %v69_v37 = vmul.f32 %v2692_v35, %v53_v6  ;;  %v2141_v6 = vld [vmem:[%s3225_s3 + $0x48] sm:$0xff] }
 0x136   :  { %v2602_v7 = vpack.c.bf16 %v2141_v6, %v2140_v5  ;;  %v2598_v5 = vpack.c.bf16 %v2137_v3, %v2136_v2 }
 0x137   :  { %v77_v39 = vmul.f32 %v2867_v36, %v69_v37  ;;  %v2118_v37 = vld [vmem:[%s3225_s3 + $0x30] sm:$0xff] }
 0x138   :  { %v2694_v40 = vpop.eup %2693 }
 0x139   :  { %v2876_v41 = vadd.f32 %v2872_v38, %v77_v39  ;;  %v70_v42 = vmul.f32 %v2694_v40, %v54_v10  ;;  %v2606_v10 = vpack.c.bf16 %v2143_v9, %v2142_v8  ;;  %v2119_v39 = vld [vmem:[%s3225_s3 + $0x38] sm:$0xff]  ;;  %v2147_v8 = vld [vmem:[%s3226_s4 + $0x48] sm:$0xff] }
 0x13b   :  { %v78_v45 = vmul.f32 %v2867_v36, %v70_v42  ;;  %2316 = vmatprep.mubr.msk.f32.mxu0 %vm43_vm0, %v2876_v41  ;;  %2327 = vmatprep.mubr.msk.f32.mxu1 %vm43_vm0, %v2876_v41  ;;  %v2572_v42 = vpack.c.bf16 %v2119_v39, %v2118_v37 }
 0x13d   :  { %v2890_v46 = vadd.f32 %v2872_v38, %v78_v45 }
 0x13f   :  { %2317 = vmatmul.mubr.msk.f32.vlgmr.msra.gmra.mrb[0].mxu0 %vm43_vm0, %v2890_v46  ;;  %2328 = vmatmul.mubr.msk.f32.vlgmr.msra.gmra.mrb[0].mxu1 %vm43_vm0, %v2890_v46 }
 0x140   :  { %2545 = vmatpush3.bf16.msra.mxu0 %v2542_v28  ;;  %2338 = vmatprep.mubr.msk.f32.mxu0 %vm43_vm0, %v2876_v41  ;;  %v2117_v28 = vld [vmem:[%s3225_s3 + $0x28] sm:$0xff] }
 0x141   :  { %2547 = vmatprep.subr.bf16.mxu0 %v2546_v47  ;;  %v2568_v29 = vpack.c.bf16 %v2117_v28, %v2116_v27  ;;  %v2172_v28 = vld [vmem:[%s3226_s4 + $0x70] sm:$0xff] }
 0x144   :  { %2549 = vmatpush3.bf16.msra.mxu0 %v2546_v47 }
 0x147   :  { %2339 = vmatmul.mubr.msk.f32.vlgmr.msra.gmra.mrb[2].mxu0 %vm43_vm0, %v2890_v46 }
 0x212   :  { %v2318_v50 = vpop.f32.mrb[0].mxu0  ;;  %v2329_v51 = vpop.f32.mrb[0].mxu1 }
 0x213   :  { %v165_v52 = vpop.f32.mrb[1].mxu0  ;;  %v244_v53 = vpop.f32.mrb[1].mxu1 }
 0x214   :  { %v2550_v55 = vpack.c.bf16 %v2329_v51, %v244_v53  ;;  %2345 = vmatprep.mubr.msk.f32.mxu1 %vm332_vm1, %v165_v52 }
 0x216   :  { %2552 = vmatprep.subr.msk.bf16.mxu1 %vm2908_vm2, %v2550_v55 }
 0x217   :  { %2555 = vmatpush3.bf16.xpose.msk.msra.mxu1 %vm2908_vm2, %v2550_v55 }
 0x218   :  { %2561 = vmatprep.subr.bf16.mxu1 %v2560_v56 }
 0x21a   :  { %v2340_v59 = vpop.f32.mrb[2].mxu0 }
 0x21b   :  { %v323_v60 = vpop.f32.mrb[3].mxu0 }
 0x21c   :  { %v2556_v61 = vpack.c.bf16 %v2340_v59, %v323_v60  ;;  %v2594_v59 = vpack.c.bf16 %v2135_v58, %v2134_v57 }
 0x21e   :  { %2557 = vmatprep.subr.bf16.mxu0 %v2556_v61  ;;  %2346 = vmatmul.mubr.msk.f32.vlgmr.msra.gmra.mrb[2].mxu1 %vm332_vm1, %v2318_v50 }
 0x21f   :  { %2559 = vmatpush3.bf16.msra.mxu0 %v2556_v61  ;;  %2563 = vmatpush3.bf16.msra.mxu1 %v2560_v56 }
 0x220   :  { %2363 = vmatprep.mubr.msk.f32.mxu1 %vm43_vm0, %v2876_v41  ;;  %2565 = vmatprep.subr.bf16.mxu1 %v2564_v62 }
 0x221   :  { %2569 = vmatprep.subr.bf16.mxu0 %v2568_v29 }
 0x223   :  { %2567 = vmatpush3.bf16.msra.mxu1 %v2564_v62 }
 0x224   :  { %2577 = vmatprep.subr.bf16.mxu1 %v2576_v1 }
 0x226   :  { %2364 = vmatmul.mubr.msk.f32.vlgmr.msra.gmra.mrb[4].mxu1 %vm43_vm0, %v2890_v46 }
 0x227   :  { %2579 = vmatpush3.bf16.msra.mxu1 %v2576_v1  ;;  %2385 = vmatprep.mubr.msk.f32.mxu1 %vm43_vm0, %v2876_v41 }
 0x228   :  { %2581 = vmatprep.subr.bf16.mxu1 %v2580_v4 }
 0x22b   :  { %2583 = vmatpush3.bf16.msra.mxu1 %v2580_v4 }
 0x22c   :  { %2603 = vmatprep.subr.bf16.mxu1 %v2602_v7 }
 0x22e   :  { %2386 = vmatmul.mubr.msk.f32.vlgmr.msra.gmra.mrb[6].mxu1 %vm43_vm0, %v2890_v46 }
 0x22f   :  { %2605 = vmatpush3.bf16.msra.mxu1 %v2602_v7  ;;  %2421 = vmatprep.mubr.msk.f32.mxu1 %vm43_vm0, %v2876_v41  ;;  %v2146_v7 = vld [vmem:[%s3226_s4 + $0x40] sm:$0xff] }
 0x230   :  { %2607 = vmatprep.subr.bf16.mxu1 %v2606_v10  ;;  %v2610_v9 = vpack.c.bf16 %v2147_v8, %v2146_v7 }
 0x233   :  { %2609 = vmatpush3.bf16.msra.mxu1 %v2606_v10  ;;  %v2148_v10 = vld [vmem:[%s3226_s4 + $0x50] sm:$0xff] }
 0x236   :  { %2422 = vmatmul.mubr.msk.f32.vlgmr.msra.gmra.mrb[8].mxu1 %vm43_vm0, %v2890_v46 }
 0x2f1   :  { %v2347_v13 = vpop.f32.mrb[2].mxu1 }
 0x2f2   :  { %v417_v14 = vadd.f32 %v2347_v13, %v2963_v11  ;;  %v411_v15 = vpop.f32.mrb[3].mxu1  ;;  %v2149_v13 = vld [vmem:[%s3226_s4 + $0x58] sm:$0xff] }
 0x2f3   :  { %v412_v16 = vadd.f32 %v411_v15, %v2968_v12  ;;  %v2158_v15 = vld [vmem:[%s3224_s2 + $0x60] sm:$0xff] }
 0x2f4   :  { %v424_v17 = vsel %vm420_vm3, %v417_v14, -inf }
 0x2f5   :  { %425 = vmax.xlane.f32.xlu1 %v424_v17  ;;  %v421_v18 = vsel %vm420_vm3, %v412_v16, -inf }
 0x2f6   :  { %422 = vmax.xlane.f32.xlu0 %v421_v18 }
 0x2f9   :  { %v2365_v19 = vpop.f32.mrb[4].mxu1 }
 0x2fa   :  { %v595_v20 = vpop.f32.mrb[5].mxu1 }
 0x301   :  { %v2387_v21 = vpop.f32.mrb[6].mxu1 }
 0x302   :  { %v755_v22 = vpop.f32.mrb[7].mxu1 }
 0x303   :  { %v2590_v23 = vpack.c.bf16 %v2387_v21, %v755_v22  ;;  %v2161_v21 = vld [vmem:[%s3224_s2 + $0x78] sm:$0xff] }
 0x309   :  { %v2423_v24 = vpop.f32.mrb[8].mxu1 }
 0x30a   :  { %v1105_v25 = vpop.f32.mrb[9].mxu1 }
 0x30b   :  { %v2618_v26 = vpack.c.bf16 %v2423_v24, %v1105_v25  ;;  %v2170_v25 = vld [vmem:[%s3226_s4 + $0x60] sm:$0xff] }
 0x30d   :  { %2620 = vmatprep.subr.msk.bf16.mxu1 %vm2908_vm2, %v2618_v26 }
 0x30e   :  { %2623 = vmatpush3.bf16.xpose.msk.msra.mxu1 %vm2908_vm2, %v2618_v26  ;;  %v2171_v26 = vld [vmem:[%s3226_s4 + $0x68] sm:$0xff] }
 0x30f   :  { %v2644_v27 = vpack.c.bf16 %v2171_v26, %v2170_v25 }
 0x382   :  { %v426_v30 = vpop.xlane.xlu1 %425 }
 0x383   :  { %v428_v31 = vsub.f32 %v417_v14, %v426_v30  ;;  %v423_v32 = vpop.xlane.xlu0 %422  ;;  %v2614_v14 = vpack.c.bf16 %v2149_v13, %v2148_v10 }
 0x384   :  { %v427_v33 = vsub.f32 %v412_v16, %v423_v32  ;;  %v2159_v16 = vld [vmem:[%s3224_s2 + $0x68] sm:$0xff] }
 0x385   :  { %v431_v34 = vmul.f32 1.442695, %v428_v31  ;;  %v2628_v17 = vpack.c.bf16 %v2159_v16, %v2158_v15 }
 0x386   :  { %v429_v35 = vmul.f32 1.442695, %v427_v33 }
 0x387   :  { %2629 = vmatprep.subr.bf16.mxu1 %v2628_v17 }
 0x388   :  { %2695 = vpow2.f32 %v429_v35 }
 0x389   :  { %2697 = vpow2.f32 %v431_v34 }
 0x392   :  { %v2990_v40 = vpop.eup %2695 }
 0x393   :  { %v2992_v43 = vpop.eup %2697  ;;  %2352 = vmatprep.mubr.msk.f32.mxu0 %vm420_vm3, %v2990_v40 }
 0x394   :  { %2353 = vmatmul.mubr.msk.f32.vlgmr.msra.gmra.mrb[4].mxu0 %vm420_vm3, %v2992_v43 }
 0x395   :  { %2571 = vmatpush3.bf16.msra.mxu0 %v2568_v29  ;;  %2374 = vmatprep.mubr.msk.f32.mxu0 %vm43_vm0, %v2876_v41  ;;  %v2173_v29 = vld [vmem:[%s3226_s4 + $0x78] sm:$0xff] }
 0x396   :  { %2573 = vmatprep.subr.bf16.mxu0 %v2572_v42  ;;  %v2648_v32 = vpack.c.bf16 %v2173_v29, %v2172_v28 }
 0x399   :  { %2575 = vmatpush3.bf16.msra.mxu0 %v2572_v42 }
 0x39c   :  { %2375 = vmatmul.mubr.msk.f32.vlgmr.msra.gmra.mrb[6].mxu0 %vm43_vm0, %v2890_v46 }
 0x39d   :  { %2392 = vmatprep.mubr.msk.f32.mxu0 %vm332_vm1, %v595_v20  ;;  %v2160_v20 = vld [vmem:[%s3224_s2 + $0x70] sm:$0xff] }
 0x39e   :  { %v2632_v24 = vpack.c.bf16 %v2161_v21, %v2160_v20 }
 0x467   :  { %v3003_v44 = vpop.f32.mrb[4].mxu0 }
 0x468   :  { %v3005_v45 = vpop.f32.mrb[5].mxu0 }
 0x46f   :  { %v2376_v47 = vpop.f32.mrb[6].mxu0 }
 0x470   :  { %v675_v48 = vpop.f32.mrb[7].mxu0 }
 0x471   :  { %v2584_v49 = vpack.c.bf16 %v2376_v47, %v675_v48 }
 0x473   :  { %2586 = vmatprep.subr.msk.bf16.mxu0 %vm2908_vm2, %v2584_v49 }
 0x474   :  { %2589 = vmatpush3.bf16.xpose.msk.msra.mxu0 %vm2908_vm2, %v2584_v49 }
 0x475   :  { %2591 = vmatprep.subr.bf16.mxu0 %v2590_v23 }
 0x47b   :  { %2393 = vmatmul.mubr.msk.f32.vlgmr.msra.gmra.mrb[8].mxu0 %vm332_vm1, %v2365_v19 }
 0x47c   :  { %2593 = vmatpush3.bf16.msra.mxu0 %v2590_v23 }
 0x47d   :  { %2595 = vmatprep.subr.bf16.mxu0 %v2594_v59 }
 0x54e   :  { %v2394_v50 = vpop.f32.mrb[8].mxu0 }
 0x54f   :  { %v848_v51 = vadd.f32 %v2394_v50, %v2963_v11  ;;  %v842_v52 = vpop.f32.mrb[9].mxu0 }
 0x550   :  { %v843_v53 = vadd.f32 %v842_v52, %v2968_v12 }
 0x551   :  { %v854_v55 = vsel %vm420_vm3, %v848_v51, -inf }
 0x552   :  { %855 = vmax.xlane.f32.xlu1 %v854_v55  ;;  %v851_v56 = vsel %vm420_vm3, %v843_v53, -inf  ;;  %v2165_v55 = vld [vmem:[%s3225_s3 + $0x68] sm:$0xff] }
 0x553   :  { %852 = vmax.xlane.f32.xlu0 %v851_v56 }
 0x5df   :  { %v856_v60 = vpop.xlane.xlu1 %855 }
 0x5e0   :  { %v858_v61 = vsub.f32 %v848_v51, %v856_v60  ;;  %v853_v62 = vpop.xlane.xlu0 %852 }
 0x5e1   :  { %v857_v63 = vsub.f32 %v843_v53, %v853_v62  ;;  %v2164_v53 = vld [vmem:[%s3225_s3 + $0x60] sm:$0xff] }
 0x5e2   :  { %v861_v0 = vmul.f32 1.442695, %v858_v61  ;;  %v2636_v56 = vpack.c.bf16 %v2165_v55, %v2164_v53 }
 0x5e3   :  { %v859_v1 = vmul.f32 1.442695, %v857_v63  ;;  %v2166_v63 = vld [vmem:[%s3225_s3 + $0x70] sm:$0xff] }
 0x5e5   :  { %2699 = vpow2.f32 %v859_v1 }
 0x5e6   :  { %2701 = vpow2.f32 %v861_v0  ;;  %v2167_v0 = vld [vmem:[%s3225_s3 + $0x78] sm:$0xff]  ;;  %s2759_s3 = smov 8  }
 0x5e7   :  { %v2640_v2 = vpack.c.bf16 %v2167_v0, %v2166_v63 }
 0x5ef   :  { %v3028_v4 = vpop.eup %2699 }
 0x5f0   :  { %v3030_v6 = vpop.eup %2701  ;;  %2399 = vmatprep.mubr.msk.f32.mxu0 %vm420_vm3, %v3028_v4  ;;  %v863_v54 = vsel %vm420_vm3, %v3028_v4, 0.0 }
 0x5f1   :  { %2400 = vmatmul.mubr.msk.f32.vlgmr.msra.gmra.mrb[10].mxu0 %vm420_vm3, %v3030_v6  ;;  %v866_v21 = vsel %vm420_vm3, %v3030_v6, 0.0 }
 0x5f2   :  { %2597 = vmatpush3.bf16.msra.mxu0 %v2594_v59  ;;  %2410 = vmatprep.mubr.msk.f32.mxu0 %vm43_vm0, %v2876_v41 }
 0x5f3   :  { %2599 = vmatprep.subr.bf16.mxu0 %v2598_v5 }
 0x5f6   :  { %2601 = vmatpush3.bf16.msra.mxu0 %v2598_v5 }
 0x5f7   :  { %2611 = vmatprep.subr.bf16.mxu0 %v2610_v9 }
 0x5f9   :  { %2411 = vmatmul.mubr.msk.f32.vlgmr.msra.gmra.mrb[12].mxu0 %vm43_vm0, %v2890_v46 }
 0x5fa   :  { %2613 = vmatpush3.bf16.msra.mxu0 %v2610_v9  ;;  %2432 = vmatprep.mubr.msk.f32.mxu0 %vm43_vm0, %v2876_v41 }
 0x5fb   :  { %2615 = vmatprep.subr.bf16.mxu0 %v2614_v14 }
 0x5fe   :  { %2617 = vmatpush3.bf16.msra.mxu0 %v2614_v14 }
 0x601   :  { %2433 = vmatmul.mubr.msk.f32.vlgmr.msra.gmra.mrb[14].mxu0 %vm43_vm0, %v2890_v46 }
 0x6c4   :  { %v3062_v18 = vpop.f32.mrb[10].mxu0 }
 0x6c5   :  { %v3064_v19 = vpop.f32.mrb[11].mxu0 }
 0x6cc   :  { %v2412_v22 = vpop.f32.mrb[12].mxu0 }
 0x6cd   :  { %v1025_v23 = vpop.f32.mrb[13].mxu0 }
 0x6ce   :  { %2439 = vmatprep.mubr.msk.f32.mxu1 %vm332_vm1, %v1025_v23 }
 0x6cf   :  { %2440 = vmatmul.mubr.msk.f32.vlgmr.msra.gmra.mrb[10].mxu1 %vm332_vm1, %v2412_v22 }
 0x6d0   :  { %2631 = vmatpush3.bf16.msra.mxu1 %v2628_v17  ;;  %2457 = vmatprep.mubr.msk.f32.mxu1 %vm43_vm0, %v2876_v41 }
 0x6d1   :  { %2633 = vmatprep.subr.bf16.mxu1 %v2632_v24 }
 0x6d4   :  { %2635 = vmatpush3.bf16.msra.mxu1 %v2632_v24  ;;  %v2434_v30 = vpop.f32.mrb[14].mxu0 }
 0x6d5   :  { %v1185_v31 = vpop.f32.mrb[15].mxu0  ;;  %2645 = vmatprep.subr.bf16.mxu1 %v2644_v27 }
 0x6d6   :  { %v2624_v33 = vpack.c.bf16 %v2434_v30, %v1185_v31 }
 0x6d7   :  { %2458 = vmatmul.mubr.msk.f32.vlgmr.msra.gmra.mrb[12].mxu1 %vm43_vm0, %v2890_v46 }
 0x6d8   :  { %2647 = vmatpush3.bf16.msra.mxu1 %v2644_v27  ;;  %2479 = vmatprep.mubr.msk.f32.mxu1 %vm43_vm0, %v2876_v41 }
 0x6d9   :  { %2625 = vmatprep.subr.bf16.mxu0 %v2624_v33  ;;  %2649 = vmatprep.subr.bf16.mxu1 %v2648_v32 }
 0x6da   :  { %2627 = vmatpush3.bf16.msra.mxu0 %v2624_v33  ;;  %v433_v33 = vsel %vm420_vm3, %v2990_v40, 0.0 }
 0x6db   :  { %2637 = vmatprep.subr.bf16.mxu0 %v2636_v56 }
 0x6dc   :  { %2651 = vmatpush3.bf16.msra.mxu1 %v2648_v32  ;;  %v436_v32 = vsel %vm420_vm3, %v2992_v43, 0.0 }
 0x6df   :  { %2480 = vmatmul.mubr.msk.f32.vlgmr.msra.gmra.mrb[14].mxu1 %vm43_vm0, %v2890_v46 }
 0x7a2   :  { %v2441_v34 = vpop.f32.mrb[10].mxu1 }
 0x7a3   :  { %v1278_v35 = vadd.f32 %v2441_v34, %v2963_v11  ;;  %v1272_v37 = vpop.f32.mrb[11].mxu1 }
 0x7a4   :  { %v1273_v39 = vadd.f32 %v1272_v37, %v2968_v12 }
 0x7a5   :  { %v1284_v42 = vsel %vm420_vm3, %v1278_v35, -inf }
 0x7a6   :  { %1285 = vmax.xlane.f32.xlu1 %v1284_v42  ;;  %v1281_v47 = vsel %vm420_vm3, %v1273_v39, -inf }
 0x7a7   :  { %1282 = vmax.xlane.f32.xlu0 %v1281_v47 }
 0x7aa   :  { %v2459_v48 = vpop.f32.mrb[12].mxu1 }
 0x7ab   :  { %v1455_v49 = vpop.f32.mrb[13].mxu1 }
 0x7b2   :  { %v2481_v50 = vpop.f32.mrb[14].mxu1 }
 0x7b3   :  { %v1615_v51 = vpop.f32.mrb[15].mxu1 }
 0x7b4   :  { %v2658_v52 = vpack.c.bf16 %v2481_v50, %v1615_v51 }
 0x7b6   :  { %2659 = vmatprep.subr.bf16.mxu1 %v2658_v52 }
 0x7b7   :  { %2661 = vmatpush3.bf16.msra.mxu1 %v2658_v52 }
 0x833   :  { %v1286_v57 = vpop.xlane.xlu1 %1285 }
 0x834   :  { %v1288_v58 = vsub.f32 %v1278_v35, %v1286_v57  ;;  %v1283_v59 = vpop.xlane.xlu0 %1282 }
 0x835   :  { %v1287_v60 = vsub.f32 %v1273_v39, %v1283_v59 }
 0x836   :  { %v1291_v61 = vmul.f32 1.442695, %v1288_v58 }
 0x837   :  { %v1289_v62 = vmul.f32 1.442695, %v1287_v60 }
 0x839   :  { %2703 = vpow2.f32 %v1289_v62 }
 0x83a   :  { %2705 = vpow2.f32 %v1291_v61 }
 0x843   :  { %v2704_v1 = vpop.eup %2703 }
 0x844   :  { %v2706_v3 = vpop.eup %2705  ;;  %2446 = vmatprep.mubr.msk.f32.mxu0 %vm420_vm3, %v2704_v1 }
 0x845   :  { %2447 = vmatmul.mubr.msk.f32.vlgmr.msra.gmra.mrb[16].mxu0 %vm420_vm3, %v2706_v3  ;;  %v1296_v22 = vsel %vm420_vm3, %v2706_v3, 0.0 }
 0x846   :  { %2639 = vmatpush3.bf16.msra.mxu0 %v2636_v56  ;;  %2468 = vmatprep.mubr.msk.f32.mxu0 %vm43_vm0, %v2876_v41 }
 0x847   :  { %2641 = vmatprep.subr.bf16.mxu0 %v2640_v2 }
 0x84a   :  { %2643 = vmatpush3.bf16.msra.mxu0 %v2640_v2 }
 0x84d   :  { %2469 = vmatmul.mubr.msk.f32.vlgmr.msra.gmra.mrb[18].mxu0 %vm43_vm0, %v2890_v46 }
 0x84e   :  { %2486 = vmatprep.mubr.msk.f32.mxu0 %vm332_vm1, %v1455_v49 }
 0x918   :  { %v3117_v5 = vpop.f32.mrb[16].mxu0 }
 0x919   :  { %v1373_v7 = vpop.f32.mrb[17].mxu0 }
 0x920   :  { %v2470_v8 = vpop.f32.mrb[18].mxu0 }
 0x921   :  { %v1535_v9 = vpop.f32.mrb[19].mxu0 }
 0x922   :  { %v2652_v10 = vpack.c.bf16 %v2470_v8, %v1535_v9 }
 0x924   :  { %2654 = vmatprep.subr.msk.bf16.mxu0 %vm2908_vm2, %v2652_v10 }
 0x925   :  { %2657 = vmatpush3.bf16.xpose.msk.msra.mxu0 %vm2908_vm2, %v2652_v10 }
 0x92c   :  { %2487 = vmatmul.mubr.msk.f32.vlgmr.msra.gmra.mrb[20].mxu0 %vm332_vm1, %v2459_v48 }
 0x9ff   :  { %v2488_v13 = vpop.f32.mrb[20].mxu0 }
 0xa00   :  { %v1708_v14 = vadd.f32 %v2488_v13, %v2963_v11  ;;  %v1702_v15 = vpop.f32.mrb[21].mxu0  ;;  %v1293_v11 = vsel %vm420_vm3, %v2704_v1, 0.0 }
 0xa01   :  { %v1703_v16 = vadd.f32 %v1702_v15, %v2968_v12 }
 0xa02   :  { %v1714_v17 = vsel %vm420_vm3, %v1708_v14, -inf }
 0xa03   :  { %1715 = vmax.xlane.f32.xlu1 %v1714_v17  ;;  %v1711_v20 = vsel %vm420_vm3, %v1703_v16, -inf }
 0xa04   :  { %1712 = vmax.xlane.f32.xlu0 %v1711_v20 }
 0xa07   :  { %867 = vadd.xlane.f32.xlu1 %v866_v21 }
 0xa08   :  { %864 = vadd.xlane.f32.xlu0 %v863_v54 }
 0xa0b   :  { %1297 = vadd.xlane.f32.xlu1 %v1296_v22 }
 0xa0c   :  { %1294 = vadd.xlane.f32.xlu0 %v1293_v11 }
 0xa90   :  { %v1716_v12 = vpop.xlane.xlu1 %1715 }
 0xa91   :  { %v1718_v23 = vsub.f32 %v1708_v14, %v1716_v12  ;;  %v1713_v24 = vpop.xlane.xlu0 %1712 }
 0xa92   :  { %v1717_v25 = vsub.f32 %v1703_v16, %v1713_v24 }
 0xa93   :  { %v1721_v26 = vmul.f32 1.442695, %v1718_v23 }
 0xa94   :  { %v1719_v27 = vmul.f32 1.442695, %v1717_v25  ;;  %v868_v31 = vpop.xlane.xlu1 %867  ;;  %v1878_v25 = vld [vmem:[%s3229_s7 + $0x8] sm:$0xff] }
 0xa95   :  { %2707 = vpow2.f32 %v1721_v26  ;;  %v865_v30 = vpop.xlane.xlu0 %864 }
 0xa96   :  { %2709 = vpow2.f32 %v1719_v27  ;;  %v1879_v27 = vld [vmem:[%s3229_s7 + $0x10] sm:$0xff] }
 0xa97   :  { %2711 = vrcp.f32 %v868_v31 }
 0xa98   :  { %v1298_v35 = vpop.xlane.xlu1 %1297 }
 0xa99   :  { %v1295_v34 = vpop.xlane.xlu0 %1294 }
 0xa9a   :  { %2713 = vrcp.f32 %v1295_v34 }
 0xa9b   :  { %2715 = vrcp.f32 %v865_v30 }
 0xa9c   :  { %2717 = vrcp.f32 %v1298_v35 }
 0xa9f   :  { %v2708_v6 = vpop.eup %2707 }
 0xaa0   :  { %v2710_v28 = vpop.eup %2709  ;;  %v1726_v29 = vsel %vm420_vm3, %v2708_v6, 0.0 }
 0xaa1   :  { %1727 = vadd.xlane.f32.xlu1 %v1726_v29  ;;  %2493 = vmatprep.mubr.msk.f32.mxu1 %vm420_vm3, %v2710_v28  ;;  %v1723_v4 = vsel %vm420_vm3, %v2710_v28, 0.0  ;;  %v2712_v37 = vpop.eup %2711 }
 0xaa2   :  { %2494 = vmatmul.mubr.msk.f32.vlgmr.msra.gmra.mrb[16].mxu1 %vm420_vm3, %v2708_v6  ;;  %1724 = vadd.xlane.f32.xlu0 %v1723_v4  ;;  %v953_v39 = vmul.f32 %v2712_v37, %v3062_v18  ;;  %v1880_v6 = vld [vmem:[%s3229_s7 + $0x18] sm:$0xff] }
 0xaa3   :  { %v2666_v28 = vpack.c.bf16 %v1880_v6, %v1879_v27 }
 0xaa4   :  { %v2714_v42 = vpop.eup %2713 }
 0xaa5   :  { %437 = vadd.xlane.f32.xlu1 %v436_v32  ;;  %v2716_v47 = vpop.eup %2715  ;;  %v1382_v43 = vmul.f32 %v2714_v42, %v1373_v7 }
 0xaa6   :  { %434 = vadd.xlane.f32.xlu0 %v433_v33  ;;  %v2718_v48 = vpop.eup %2717  ;;  %v952_v40 = vmul.f32 %v2716_v47, %v3064_v19 }
 0xaa7   :  { %v1383_v49 = vmul.f32 %v2718_v48, %v3117_v5 }
 0xab6   :  { %1818 = vrot.lane.b32.xlu1 %v953_v39, %s2759_s3 }
 0xaba   :  { %1824 = vrot.lane.b32.xlu1 %v1382_v43, %s2760_s1 }
 0xabc   :  { %1816 = vrot.lane.b32.xlu0 %v952_v40, %s2759_s3  ;;  %v1979_v40 = vld [vmem:[%s3231_s9] sm:$0xff] }
 0xabe   :  { %1826 = vrot.lane.b32.xlu1 %v1383_v49, %s2760_s1  ;;  %v1980_v49 = vld [vmem:[%s3231_s9 + $0x8] sm:$0xff] }
 0xb2e   :  { %v1728_v50 = vpop.xlane.xlu1 %1727 }
 0xb2f   :  { %v1725_v51 = vpop.xlane.xlu0 %1724  ;;  %2719 = vrcp.f32 %v1728_v50  ;;  %v2670_v50 = vpack.c.bf16 %v1980_v49, %v1979_v40 }
 0xb30   :  { %2721 = vrcp.f32 %v1725_v51 }
 0xb31   :  { %2671 = vmatprep.subr.bf16.mxu1 %v2670_v50 }
 0xb32   :  { %v438_v58 = vpop.xlane.xlu1 %437  ;;  %2673 = vmatpush3.bf16.msra.mxu1 %v2670_v50 }
 0xb33   :  { %v435_v19 = vpop.xlane.xlu0 %434  ;;  %2723 = vrcp.f32 %v438_v58  ;;  %v2182_v58 = vld [vmem:[%s3230_s8] ss:$0 sm:$0xff] }
 0xb34   :  { %2725 = vrcp.f32 %v435_v19 }
 0xb36   :  { %v1819_v59 = vpop.permute.xlu1 %1818 }
 0xb37   :  { %v1817_v3 = vpop.permute.xlu0 %1816 }
 0xb39   :  { %v2720_v18 = vpop.eup %2719 }
 0xb3a   :  { %v2722_v53 = vpop.eup %2721  ;;  %v1825_v61 = vpop.permute.xlu1 %1824 }
 0xb3d   :  { %v2724_v60 = vpop.eup %2723 }
 0xb3e   :  { %v2726_v62 = vpop.eup %2725  ;;  %v523_v63 = vmul.f32 %v2724_v60, %v3003_v44  ;;  %v1827_v1 = vpop.permute.xlu1 %1826 }
 0xb3f   :  { %v522_v0 = vmul.f32 %v2726_v62, %v3005_v45 }
 0xb40   :  { %v1839_v2 = vsel %vm332_vm1, %v523_v63, %v1819_v59 }
 0xb41   :  { %v1838_v5 = vsel %vm332_vm1, %v522_v0, %v1817_v3  ;;  %v1841_v7 = vsel %vm420_vm3, %v1839_v2, %v1827_v1 }
 0xb42   :  { %v1840_v9 = vsel %vm420_vm3, %v1838_v5, %v1825_v61 }
 0xb75   :  { %v2495_v52 = vpop.f32.mrb[16].mxu1 }
 0xb76   :  { %v1813_v55 = vmul.f32 %v2720_v18, %v2495_v52  ;;  %v1803_v56 = vpop.f32.mrb[17].mxu1  ;;  %v1983_v18 = vld [vmem:[%s3231_s9 + $0x20] sm:$0xff]  ;;  %v1984_v52 = vld [vmem:[%s3231_s9 + $0x28] sm:$0xff] }
 0xb77   :  { %v1812_v57 = vmul.f32 %v2722_v53, %v1803_v56  ;;  %v2678_v53 = vpack.c.bf16 %v1984_v52, %v1983_v18  ;;  %v1986_v56 = vld [vmem:[%s3231_s9 + $0x38] sm:$0xff] }
 0xb78   :  { %1834 = vrot.lane.b32.xlu1 %v1813_v55, %s2761_s13  ;;  %v1985_v55 = vld [vmem:[%s3231_s9 + $0x30] sm:$0xff] }
 0xb79   :  { %1832 = vrot.lane.b32.xlu0 %v1812_v57, %s2761_s13  ;;  %v2682_v57 = vpack.c.bf16 %v1986_v56, %v1985_v55 }
 0xbea   :  { %v1835_v8 = vpop.permute.xlu1 %1834 }
 0xbeb   :  { %v1844_v10 = vsel %vm1842_vm4, %v1841_v7, %v1835_v8  ;;  %v1833_v13 = vpop.permute.xlu0 %1832 }
 0xbec   :  { %v1843_v14 = vsel %vm1842_vm4, %v1840_v9, %v1833_v13  ;;  %v1846_v15 = vadd.f32 %v1844_v10, %v2890_v46  ;;  %v2185_v10 = vld [vmem:[%s3232_s10] ss:$0 sm:$0xff] }
 0xbed   :  { %v1845_v44 = vadd.f32 %v1843_v14, %v2876_v41  ;;  %v1877_v41 = vld [vmem:[%s3229_s7] sm:$0xff] }
 0xbee   :  { %v1850_v45 = vsel %vm43_vm0, %v1846_v15, 0.0  ;;  %v2662_v26 = vpack.c.bf16 %v1878_v25, %v1877_v41 }
 0xbef   :  { %1851 = vadd.xlane.f32.xlu1 %v1850_v45  ;;  %v1847_v16 = vsel %vm43_vm0, %v1845_v44, 0.0 }
 0xbf0   :  { %1848 = vadd.xlane.f32.xlu0 %v1847_v16  ;;  %2663 = vmatprep.subr.bf16.mxu0 %v2662_v26 }
 0xbf1   :  { %2665 = vmatpush3.bf16.msra.mxu0 %v2662_v26 }
 0xbf2   :  { %2667 = vmatprep.subr.bf16.mxu0 %v2666_v28 }
 0xbf5   :  { %2669 = vmatpush3.bf16.msra.mxu0 %v2666_v28 }
 0xc7c   :  { %v1852_v17 = vpop.xlane.xlu1 %1851 }
 0xc7d   :  { %v1854_v20 = vmul.f32 0.03125, %v1852_v17  ;;  %v1849_v21 = vpop.xlane.xlu0 %1848 }
 0xc7e   :  { %v1853_v54 = vmul.f32 0.03125, %v1849_v21 }
 0xc7f   :  { %v1856_v22 = vsub.f32 %v1846_v15, %v1854_v20 }
 0xc80   :  { %v1855_v11 = vsub.f32 %v1845_v44, %v1853_v54 }
 0xc81   :  { %v1858_v24 = vmul.f32 %v1856_v22, %v1856_v22 }
 0xc82   :  { %v1857_v12 = vmul.f32 %v1855_v11, %v1855_v11 }
 0xc83   :  { %v1862_v46 = vsel %vm43_vm0, %v1858_v24, 0.0 }
 0xc84   :  { %v1859_v23 = vsel %vm43_vm0, %v1857_v12, 0.0 }
 0xc85   :  { %1860 = vadd.xlane.f32.xlu0 %v1859_v23 }
 0xc89   :  { %1863 = vadd.xlane.f32.xlu0 %v1862_v46 }
 0xd12   :  { %v1861_v29 = vpop.xlane.xlu0 %1860 }
 0xd13   :  { %v1865_v4 = vmul.f32 0.03125, %v1861_v29 }
 0xd15   :  { %v1867_v30 = vadd.f32 1e-05, %v1865_v4 }
 0xd16   :  { %v1864_v31 = vpop.xlane.xlu0 %1863 }
 0xd17   :  { %2727 = vrsqrt.f32 %v1867_v30  ;;  %v1866_v32 = vmul.f32 0.03125, %v1864_v31 }
 0xd19   :  { %v1868_v33 = vadd.f32 1e-05, %v1866_v32 }
 0xd1b   :  { %2729 = vrsqrt.f32 %v1868_v33 }
 0xd21   :  { %v2728_v34 = vpop.eup %2727 }
 0xd22   :  { %v1871_v35 = vmul.f32 %v2728_v34, %v1855_v11 }
 0xd24   :  { %v1873_v37 = vmul.f32 %v2867_v36, %v1871_v35 }
 0xd25   :  { %v2730_v39 = vpop.eup %2729 }
 0xd26   :  { %v1872_v42 = vmul.f32 %v2730_v39, %v1856_v22  ;;  %v1875_v47 = vadd.f32 %v2872_v38, %v1873_v37 }
 0xd28   :  { %v1874_v43 = vmul.f32 %v2867_v36, %v1872_v42  ;;  %2504 = vmatprep.mubr.msk.f32.mxu0 %vm43_vm0, %v1875_v47  ;;  %v1981_v36 = vld [vmem:[%s3231_s9 + $0x10] sm:$0xff] }
 0xd2a   :  { %v1876_v48 = vadd.f32 %v2872_v38, %v1874_v43  ;;  %v1982_v38 = vld [vmem:[%s3231_s9 + $0x18] sm:$0xff] }
 0xd2b   :  { %v2674_v51 = vpack.c.bf16 %v1982_v38, %v1981_v36 }
 0xd2c   :  { %2505 = vmatmul.mubr.msk.f32.vlgmr.msra.gmra.mrb[22].mxu0 %vm43_vm0, %v1876_v48 }
 0xd2d   :  { %2675 = vmatprep.subr.bf16.mxu1 %v2674_v51 }
 0xd2e   :  { %2677 = vmatpush3.bf16.msra.mxu1 %v2674_v51 }
 0xd2f   :  { %2679 = vmatprep.subr.bf16.mxu1 %v2678_v53 }
 0xd32   :  { %2681 = vmatpush3.bf16.msra.mxu1 %v2678_v53 }
 0xd33   :  { %2683 = vmatprep.subr.bf16.mxu1 %v2682_v57 }
 0xd36   :  { %2685 = vmatpush3.bf16.msra.mxu1 %v2682_v57 }
 0xdff   :  { %v2506_v19 = vpop.f32.mrb[22].mxu0 }
 0xe00   :  { %v1966_v59 = vadd.f32 %v2506_v19, %v2182_v58  ;;  %v1960_v60 = vpop.f32.mrb[23].mxu0 }
 0xe01   :  { %v1961_v61 = vadd.f32 %v2182_v58, %v1960_v60 }
 0xe02   :  { %v1972_v62 = vmul.f32 0.70710677, %v1966_v59  ;;  %v1970_v7 = vmul.f32 0.5, %v1966_v59 }
 0xe03   :  { %v1971_v63 = vmul.f32 0.70710677, %v1961_v61  ;;  %v1969_v3 = vmul.f32 0.5, %v1961_v61 }
 0xe04   :  { %2731 = verf.f32 %v1972_v62 }
 0xe05   :  { %2733 = verf.f32 %v1971_v63 }
 0xe0e   :  { %v2732_v0 = vpop.eup %2731 }
 0xe0f   :  { %v2734_v1 = vpop.eup %2733  ;;  %v1976_v2 = vadd.f32 1.0, %v2732_v0 }
 0xe10   :  { %v1975_v5 = vadd.f32 1.0, %v2734_v1 }
 0xe11   :  { %v1978_v9 = vmul.f32 %v1976_v2, %v1970_v7 }
 0xe12   :  { %v1977_v8 = vmul.f32 %v1975_v5, %v1969_v3 }
 0xe14   :  { %2523 = vmatprep.mubr.msk.f32.mxu1 %vm1994_vm5, %v1977_v8 }
 0xe15   :  { %2524 = vmatmul.mubr.msk.f32.vlgmr.msra.gmra.mrb[18].mxu1 %vm1994_vm5, %v1978_v9 }
 0xee8   :  { %v2525_v13 = vpop.f32.mrb[18].mxu1 }
 0xee9   :  { %v2073_v14 = vadd.f32 %v2525_v13, %v2185_v10  ;;  %v2067_v15 = vpop.f32.mrb[19].mxu1 }
 0xeea   :  { %v2068_v44 = vadd.f32 %v2185_v10, %v2067_v15 }
 0xeeb   :  { %v2077_v45 = vadd.f32 %v2073_v14, %v1876_v48 }
 0xeec   :  { %v2076_v16 = vadd.f32 %v2068_v44, %v1875_v47 }
 0xeed   :  { %2079 = vst.msk [vmem:[#allocation2 + $0x8] sm:$0xff] %vm43_vm0, %v2077_v45 }
 0xeee   :  { %2078 = vst.msk [vmem:[#allocation2] sm:$0xff] %vm43_vm0, %v2076_v16 }
 0xeef   :  { %2746 = shalt.err (!%p2743_p4)
}
 0xef0   :  { %s2747_s18 = scalar_lea.hbm %s3233_s11, 256 }
 0xef1   :  { %p2748_p5 = scmp.ne.s32.totalorder %s3233_s11, %s2747_s18  ;;  %p2751_p6 = scmp.lt.u32.totalorder %s2747_s18, %s3233_s11 }
 0xef3   :  { %p2753_p7 = pnand %p2751_p6, %p2748_p5 }
 0xef5   :  { %2756 = shalt.err (!%p2753_p7)
}
 0xef6   :  { %s2763_s21 = smov 128  }
 0xef7   :  { %2091 = dma.vmem_to_hbm [thread:$0]  %s2086_s15, 256, %s3233_s11, [#allocation3], %s2763_s21, %s2763_s21, %s2759_s3  }
 0xef8   :  { %2757 = dma.done.wait [#allocation3], 256  }
 0xef9   :  { %2758 = vsyncadd [#allocation3], 4294967040 }
 0xefa   :  { %2095 = vsyncpa [#allocation3], 1 }

</bundles_post_ra>
